<compile_context>
chip_gen: v7x
topology: tpu7x:2x2x1
jax: 0.10.0
libtpu: 0.0.40
codegen_flags: <defaults>
</compile_context>

<pallas_src>
import functools

import jax
import jax.numpy as jnp
from jax.experimental import pallas as pl
from jax.experimental.pallas import tpu as pltpu


def _loss_kernel(tgt_ref, pred_ref, cpred_ref, out_ref, *,
                 n_valid, blocks_per_part, lam_over_n, taskmult_over_n,
                 is_top5, compute_task_loss):
    p = pl.program_id(0)   # parallel partition
    i = pl.program_id(1)   # arbitrary (reduction) axis within the partition

    @pl.when(i == 0)
    def _():
        out_ref[...] = jnp.zeros_like(out_ref)

    pred = pred_ref[...]                              # (TN, C) native dtype
    tgt = tgt_ref[...]                                # (TN, 1) int32 class ids
    x = cpred_ref[...].astype(jnp.float32)            # (TN, 1) correctness logit

    tn, c = pred.shape

    # Row validity mask.  block_start uses the *unclamped* global block index,
    # so fully out-of-range blocks (parallel-split overhang) and the partial
    # last block are both masked out here.
    block_start = (p * blocks_per_part + i) * tn
    row_ids = jax.lax.broadcasted_iota(jnp.int32, (tn, 1), 0) + block_start
    valid = row_ids < n_valid                                           # (TN,1)

    # Target logit via iota compare (no one-hot input), native dtype, exact.
    col_ids = jax.lax.broadcasted_iota(jnp.int32, (tn, c), 1)
    zero = jnp.zeros((), pred.dtype)
    target_logit = jnp.sum(jnp.where(col_ids == tgt, pred, zero),
                           axis=-1, keepdims=True)                      # (TN,1)

    acc = jnp.zeros((tn, 1), jnp.float32)

    # Row max only when actually needed (task loss and/or top-1 indicator).
    if compute_task_loss or not is_top5:
        m = jnp.max(pred, axis=-1, keepdims=True)                       # native

    # --- per-sample cross entropy: logsumexp(pred) - pred[target] (f32) ---
    if compute_task_loss:
        mf32 = m.astype(jnp.float32)
        diff = pred.astype(jnp.float32) - mf32        # widen only for exp pass
        lse = mf32 + jnp.log(jnp.sum(jnp.exp(diff), axis=-1, keepdims=True))
        ce = lse - target_logit.astype(jnp.float32)                     # (TN,1)
        acc = acc + taskmult_over_n * jnp.where(valid, ce, 0.0)

    # --- correctness indicator (top-1 or top-5), compares in native dtype ---
    if is_top5:
        greater = jnp.sum(jnp.where(pred > target_logit,
                                    jnp.int32(1), jnp.int32(0)),
                          axis=-1, keepdims=True)                       # (TN,1)
        correctness = (greater < 5).astype(jnp.float32)
    else:
        # target attains the row max  <=>  argmax hit (modulo ties, see TODO)
        correctness = (target_logit >= m).astype(jnp.float32)

    # --- BCEWithLogits: only the correctness-dependent (-x*y) part is per-row;
    #     the softplus(x) part is added once in the wrapper. ---
    acc = acc + (-lam_over_n) * jnp.where(valid, x * correctness, 0.0)

    out_ref[...] += acc


def correctness_prediction_loss(prediction, correctness_prediction, target, *,
                                lambda_uncertainty_loss, is_ignore_task_loss,
                                is_top5, block_n=None, num_partitions=2):
    """prediction: (N, C) logits (any float dtype, streamed in native dtype);
    correctness_prediction: (N,) float logits; target: (N,) int class indices.
    Returns scalar f32 loss."""
    n, c = prediction.shape
    itemsize = jnp.dtype(prediction.dtype).itemsize

    # Row tile: multiple of 8; native logits tile <= ~6 MiB (safe on v7x's
    # 64 MiB VMEM) and whole working set (2 pipelined native buffers + ~2 f32
    # temporaries) <= ~28 MiB, under the 40 MiB scoped-vmem limit requested.
    if block_n is None:
        block_n = min(1024, pl.next_power_of_2(max(n, 8)))
    block_n = max(8, (int(block_n) // 8) * 8)
    while block_n > 8 and (block_n * c * itemsize > (6 << 20)
                           or block_n * c * (2 * itemsize + 8) > (28 << 20)):
        block_n //= 2
    block_n = max(8, (block_n // 8) * 8)

    n_blocks = pl.cdiv(n, block_n)
    num_partitions = max(1, min(int(num_partitions), n_blocks))
    blocks_per_part = pl.cdiv(n_blocks, num_partitions)

    tgt2 = target.astype(jnp.int32).reshape(n, 1)
    cpred_f32 = correctness_prediction.astype(jnp.float32)
    cpred2 = cpred_f32.reshape(n, 1)

    task_mult = 1.0 - float(int(is_ignore_task_loss))
    lam_over_n = float(lambda_uncertainty_loss) / float(n)

    kernel = functools.partial(
        _loss_kernel,
        n_valid=int(n),
        blocks_per_part=int(blocks_per_part),
        lam_over_n=lam_over_n,
        taskmult_over_n=task_mult / float(n),
        is_top5=bool(is_top5),
        compute_task_loss=(task_mult != 0.0),
    )

    def in_map(p, i):
        # Clamp so phantom blocks (parallel-split overhang) stay in bounds;
        # their rows are fully masked in-kernel via `valid`.
        return (jnp.minimum(p * blocks_per_part + i, n_blocks - 1), 0)

    partial = pl.pallas_call(
        kernel,
        out_shape=jax.ShapeDtypeStruct((num_partitions, block_n, 1),
                                       jnp.float32),
        grid=(num_partitions, blocks_per_part),
        in_specs=[
            pl.BlockSpec((block_n, 1), in_map),   # target ids (int32)
            pl.BlockSpec((block_n, c), in_map),   # logits, native dtype
            pl.BlockSpec((block_n, 1), in_map),   # correctness logits (f32)
        ],
        # Resident per-partition column accumulator (index depends on p only).
        out_specs=pl.BlockSpec((None, block_n, 1), lambda p, i: (p, 0, 0)),
        compiler_params=pltpu.CompilerParams(
            dimension_semantics=("parallel", "arbitrary"),
            vmem_limit_bytes=40 * 1024 * 1024,
        ),
    )(tgt2, prediction, cpred2)

    # Correctness-independent part of BCEWithLogits (softplus term), O(N),
    # computed over the un-padded cpred so no spurious log(2) contributions.
    softplus_sum = jnp.sum(jnp.maximum(cpred_f32, 0.0)
                           + jnp.log1p(jnp.exp(-jnp.abs(cpred_f32))))
    return jnp.sum(partial) + lam_over_n * softplus_sum


def _reference(prediction, correctness_prediction, target, *,
               lambda_uncertainty_loss, is_ignore_task_loss, is_top5):
    # Pure-JAX reference (computed in f32).
    pred = prediction.astype(jnp.float32)
    lse = jax.scipy.special.logsumexp(pred, axis=-1)
    tgt_logit = jnp.take_along_axis(pred, target[:, None], axis=-1)[:, 0]
    ce = lse - tgt_logit
    greater = jnp.sum(pred > tgt_logit[:, None], axis=-1)
    if is_top5:
        correctness = (greater < 5).astype(jnp.float32)
    else:
        correctness = (greater == 0).astype(jnp.float32)
    x = correctness_prediction.astype(jnp.float32)
    bce = jnp.mean(jnp.maximum(x, 0.0) - x * correctness
                   + jnp.log1p(jnp.exp(-jnp.abs(x))))
    return (1 - int(is_ignore_task_loss)) * jnp.mean(ce) \
        + lambda_uncertainty_loss * bce


if __name__ == "__main__":
    key = jax.random.PRNGKey(0)
    k1, k2, k3, k4, k5, k6 = jax.random.split(key, 6)

    # ---- test 1: single tile, top-5 ----
    N, C = 8, 32
    prediction = jax.random.normal(k1, (N, C), dtype=jnp.float32)
    correctness_prediction = jax.random.normal(k2, (N,), dtype=jnp.float32)
    target = jax.random.randint(k3, (N,), 0, C, dtype=jnp.int32)

    cfg = dict(lambda_uncertainty_loss=0.5, is_ignore_task_loss=0, is_top5=True)
    loss = correctness_prediction_loss(
        prediction, correctness_prediction, target, **cfg)
    jax.block_until_ready(loss)
    ref = _reference(prediction, correctness_prediction, target, **cfg)
    assert jnp.allclose(loss, ref, atol=1e-5, rtol=1e-5), (loss, ref)

    # ---- test 2: top-1 path ----
    cfg1 = dict(lambda_uncertainty_loss=0.25, is_ignore_task_loss=0, is_top5=False)
    loss1 = correctness_prediction_loss(
        prediction, correctness_prediction, target, **cfg1)
    jax.block_until_ready(loss1)
    ref1 = _reference(prediction, correctness_prediction, target, **cfg1)
    assert jnp.allclose(loss1, ref1, atol=1e-5, rtol=1e-5), (loss1, ref1)

    # ---- test 3: multi-tile, 2-partition grid, un-padded remainder rows,
    #              ignore-task-loss on/off ----
    N2, C2 = 20, 100
    pred2 = jax.random.normal(k4, (N2, C2), dtype=jnp.float32)
    cpred2 = jax.random.normal(k5, (N2,), dtype=jnp.float32)
    tgt2 = jax.random.randint(k6, (N2,), 0, C2, dtype=jnp.int32)
    for ignore in (0, 1):
        cfg2 = dict(lambda_uncertainty_loss=0.7, is_ignore_task_loss=ignore,
                    is_top5=True)
        l2 = correctness_prediction_loss(pred2, cpred2, tgt2, block_n=8, **cfg2)
        jax.block_until_ready(l2)
        r2 = _reference(pred2, cpred2, tgt2, **cfg2)
        assert jnp.allclose(l2, r2, atol=1e-5, rtol=1e-5), (ignore, l2, r2)

    # ---- test 4: bf16 logits streamed in native dtype (no wrapper up-cast) ----
    pred_bf16 = pred2.astype(jnp.bfloat16)
    cfg3 = dict(lambda_uncertainty_loss=0.3, is_ignore_task_loss=0, is_top5=False)
    l3 = correctness_prediction_loss(pred_bf16, cpred2, tgt2, block_n=8, **cfg3)
    jax.block_until_ready(l3)
    r3 = _reference(pred_bf16, cpred2, tgt2, **cfg3)
    assert jnp.allclose(l3, r3, atol=1e-5, rtol=1e-5), (l3, r3)

    print("KERNEL_OK")
</pallas_src>

<mosaic_0001>
module attributes {stable_mosaic.version = 11 : i64} {
  func.func @_loss_kernel(%arg0: i32, %arg1: i32, %arg2: memref<8x1xi32, #tpu.memory_space<vmem>>, %arg3: memref<8x32xf32, #tpu.memory_space<vmem>>, %arg4: memref<8x1xf32, #tpu.memory_space<vmem>>, %arg5: memref<1x8x1xf32, #tpu.memory_space<vmem>>) attributes {dimension_semantics = [#tpu.dimension_semantics<parallel>, #tpu.dimension_semantics<arbitrary>], iteration_bounds = array<i64: 1, 1>, scalar_prefetch = 0 : i64, scratch_operands = 0 : i64, tpu.core_type = #tpu.core_type<tc>, window_params = [{transform_indices = @transform_0, window_bounds = array<i64: 8, 1>}, {transform_indices = @transform_1, window_bounds = array<i64: 8, 32>}, {transform_indices = @transform_2, window_bounds = array<i64: 8, 1>}, {transform_indices = @transform_3, window_bounds = array<i64: 1, 8, 1>}]} {
    %c0_i32 = arith.constant 0 : i32
    %0 = arith.cmpi eq, %arg1, %c0_i32 : i32
    %1 = arith.extui %0 : i1 to i32
    %c0_i32_0 = arith.constant 0 : i32
    %2 = arith.cmpi ne, %1, %c0_i32_0 : i32
    scf.if %2 {
      %cst_24 = arith.constant 0.000000e+00 : f32
      %60 = vector.broadcast %cst_24 : f32 to vector<8x1xf32>
      %c0_25 = arith.constant 0 : index
      %c0_26 = arith.constant 0 : index
      %c0_27 = arith.constant 0 : index
      %61 = vector.load %arg5[%c0_25, %c0_26, %c0_27] : memref<1x8x1xf32, #tpu.memory_space<vmem>>, vector<1x8x1xf32>
      %62 = vector.shape_cast %61 : vector<1x8x1xf32> to vector<8x1xf32>
      %63 = vector.shape_cast %60 : vector<8x1xf32> to vector<1x8x1xf32>
      tpu.vector_store %arg5[%c0_25, %c0_26, %c0_27], %63 {strides = array<i32>} : memref<1x8x1xf32, #tpu.memory_space<vmem>>, vector<1x8x1xf32>,
    } else {
    }
    %c0 = arith.constant 0 : index
    %c0_1 = arith.constant 0 : index
    %3 = vector.load %arg3[%c0, %c0_1] : memref<8x32xf32, #tpu.memory_space<vmem>>, vector<8x32xf32>
    %c0_2 = arith.constant 0 : index
    %c0_3 = arith.constant 0 : index
    %4 = vector.load %arg2[%c0_2, %c0_3] : memref<8x1xi32, #tpu.memory_space<vmem>>, vector<8x1xi32>
    %c0_4 = arith.constant 0 : index
    %c0_5 = arith.constant 0 : index
    %5 = vector.load %arg4[%c0_4, %c0_5] : memref<8x1xf32, #tpu.memory_space<vmem>>, vector<8x1xf32>
    %c1_i32 = arith.constant 1 : i32
    %6 = arith.muli %arg0, %c1_i32 : i32
    %7 = arith.addi %6, %arg1 : i32
    %c8_i32 = arith.constant 8 : i32
    %8 = arith.muli %7, %c8_i32 : i32
    %9 = tpu.iota {dimensions = array<i32: 0>} : vector<8x1xi32>
    %10 = vector.broadcast %8 : i32 to vector<8x1xi32>
    %11 = arith.addi %9, %10 : vector<8x1xi32>
    %c8_i32_6 = arith.constant 8 : i32
    %12 = vector.broadcast %c8_i32_6 : i32 to vector<8x1xi32>
    %13 = arith.cmpi slt, %11, %12 : vector<8x1xi32>
    %14 = tpu.iota {dimensions = array<i32: 1>} : vector<8x32xi32>
    %15 = vector.broadcast %4 : vector<8x1xi32> to vector<8x32xi32>
    %16 = arith.cmpi eq, %14, %15 : vector<8x32xi32>
    %cst = arith.constant 0.000000e+00 : f32
    %17 = vector.broadcast %cst : f32 to vector<8x32xf32>
    %18 = arith.select %16, %3, %17 : vector<8x32xi1>, vector<8x32xf32>
    %cst_7 = arith.constant dense<0.000000e+00> : vector<8xf32>
    %19 = vector.multi_reduction <add>, %18, %cst_7 [1] : vector<8x32xf32> to vector<8xf32>
    %20 = vector.shape_cast %19 : vector<8xf32> to vector<8x1xf32>
    %cst_8 = arith.constant 0.000000e+00 : f32
    %21 = vector.broadcast %cst_8 : f32 to vector<8x1xf32>
    %cst_9 = arith.constant dense<0xFF800000> : vector<8xf32>
    %22 = vector.multi_reduction <maximumf>, %3, %cst_9 [1] : vector<8x32xf32> to vector<8xf32>
    %23 = vector.shape_cast %22 : vector<8xf32> to vector<8x1xf32>
    %24 = vector.broadcast %23 : vector<8x1xf32> to vector<8x32xf32>
    %25 = arith.subf %3, %24 : vector<8x32xf32>
    %26 = math.exp %25 : vector<8x32xf32>
    %cst_10 = arith.constant dense<0.000000e+00> : vector<8xf32>
    %27 = vector.multi_reduction <add>, %26, %cst_10 [1] : vector<8x32xf32> to vector<8xf32>
    %28 = vector.shape_cast %27 : vector<8xf32> to vector<8x1xf32>
    %29 = math.log %28 : vector<8x1xf32>
    %30 = arith.addf %23, %29 : vector<8x1xf32>
    %31 = arith.subf %30, %20 : vector<8x1xf32>
    %cst_11 = arith.constant 0.000000e+00 : f32
    %32 = vector.broadcast %cst_11 : f32 to vector<8x1xf32>
    %33 = arith.select %13, %31, %32 : vector<8x1xi1>, vector<8x1xf32>
    %cst_12 = arith.constant 1.250000e-01 : f32
    %34 = vector.broadcast %cst_12 : f32 to vector<8x1xf32>
    %35 = arith.mulf %34, %33 : vector<8x1xf32>
    %36 = arith.addf %21, %35 : vector<8x1xf32>
    %37 = vector.broadcast %20 : vector<8x1xf32> to vector<8x32xf32>
    %38 = arith.cmpf ogt, %3, %37 : vector<8x32xf32>
    %c1_i32_13 = arith.constant 1 : i32
    %c0_i32_14 = arith.constant 0 : i32
    %39 = vector.broadcast %c1_i32_13 : i32 to vector<8x32xi32>
    %40 = vector.broadcast %c0_i32_14 : i32 to vector<8x32xi32>
    %41 = arith.select %38, %39, %40 : vector<8x32xi1>, vector<8x32xi32>
    %cst_15 = arith.constant dense<0> : vector<8xi32>
    %42 = vector.multi_reduction <add>, %41, %cst_15 [1] : vector<8x32xi32> to vector<8xi32>
    %43 = vector.shape_cast %42 : vector<8xi32> to vector<8x1xi32>
    %c5_i32 = arith.constant 5 : i32
    %44 = vector.broadcast %c5_i32 : i32 to vector<8x1xi32>
    %45 = arith.cmpi slt, %43, %44 : vector<8x1xi32>
    %46 = arith.extui %45 : vector<8x1xi1> to vector<8x1xi32>
    %47 = arith.sitofp %46 : vector<8x1xi32> to vector<8x1xf32>
    %48 = arith.mulf %5, %47 : vector<8x1xf32>
    %cst_16 = arith.constant 0.000000e+00 : f32
    %49 = vector.broadcast %cst_16 : f32 to vector<8x1xf32>
    %50 = arith.select %13, %48, %49 : vector<8x1xi1>, vector<8x1xf32>
    %cst_17 = arith.constant -6.250000e-02 : f32
    %51 = vector.broadcast %cst_17 : f32 to vector<8x1xf32>
    %52 = arith.mulf %51, %50 : vector<8x1xf32>
    %53 = arith.addf %36, %52 : vector<8x1xf32>
    %c0_18 = arith.constant 0 : index
    %c0_19 = arith.constant 0 : index
    %c0_20 = arith.constant 0 : index
    %54 = vector.load %arg5[%c0_18, %c0_19, %c0_20] : memref<1x8x1xf32, #tpu.memory_space<vmem>>, vector<1x8x1xf32>
    %55 = vector.shape_cast %54 : vector<1x8x1xf32> to vector<8x1xf32>
    %56 = arith.addf %55, %53 : vector<8x1xf32>
    %c0_21 = arith.constant 0 : index
    %c0_22 = arith.constant 0 : index
    %c0_23 = arith.constant 0 : index
    %57 = vector.load %arg5[%c0_21, %c0_22, %c0_23] : memref<1x8x1xf32, #tpu.memory_space<vmem>>, vector<1x8x1xf32>
    %58 = vector.shape_cast %57 : vector<1x8x1xf32> to vector<8x1xf32>
    %59 = vector.shape_cast %56 : vector<8x1xf32> to vector<1x8x1xf32>
    tpu.vector_store %arg5[%c0_21, %c0_22, %c0_23], %59 {strides = array<i32>} : memref<1x8x1xf32, #tpu.memory_space<vmem>>, vector<1x8x1xf32>,
    return
  }
  func.func @transform_0(%arg0: i32, %arg1: i32) -> (i32, i32) {
    %c1_i32 = arith.constant 1 : i32
    %0 = arith.muli %arg0, %c1_i32 : i32
    %1 = arith.addi %0, %arg1 : i32
    %c0_i32 = arith.constant 0 : i32
    %2 = arith.minsi %1, %c0_i32 : i32
    %c0_i32_0 = arith.constant 0 : i32
    %c0_i32_1 = arith.constant 0 : i32
    return %2, %c0_i32_0 : i32, i32
  }
  func.func @transform_1(%arg0: i32, %arg1: i32) -> (i32, i32) {
    %c1_i32 = arith.constant 1 : i32
    %0 = arith.muli %arg0, %c1_i32 : i32
    %1 = arith.addi %0, %arg1 : i32
    %c0_i32 = arith.constant 0 : i32
    %2 = arith.minsi %1, %c0_i32 : i32
    %c0_i32_0 = arith.constant 0 : i32
    %c0_i32_1 = arith.constant 0 : i32
    return %2, %c0_i32_0 : i32, i32
  }
  func.func @transform_2(%arg0: i32, %arg1: i32) -> (i32, i32) {
    %c1_i32 = arith.constant 1 : i32
    %0 = arith.muli %arg0, %c1_i32 : i32
    %1 = arith.addi %0, %arg1 : i32
    %c0_i32 = arith.constant 0 : i32
    %2 = arith.minsi %1, %c0_i32 : i32
    %c0_i32_0 = arith.constant 0 : i32
    %c0_i32_1 = arith.constant 0 : i32
    return %2, %c0_i32_0 : i32, i32
  }
  func.func @transform_3(%arg0: i32, %arg1: i32) -> (i32, i32, i32) {
    %c0_i32 = arith.constant 0 : i32
    %c0_i32_0 = arith.constant 0 : i32
    %c0_i32_1 = arith.constant 0 : i32
    return %arg0, %c0_i32, %c0_i32_0 : i32, i32, i32
  }
}

</mosaic_0001>

<bundles_post_ra>
// kernel: tpu_custom_call.1
= control target key start
LH: loop header
LB: loop body
LE: loop exit
PB: predicated region body
PF: predicated region fallthrough
CT: control target
= control target key end

     0   :  { %v194_v0 = vmov 0   ;;  %vm118_vm0 = vcmask 261120   ;;  %v111_v4 = vlaneseq  ;;  %vm99_vm3 = vcmask 7168   ;;  %s240_s0 = inlined_call_operand.vmem [shape: s32[8,1], index: 0, kind: input, shape index: {}]   ;;  %s241_s1 = inlined_call_operand.vmem [shape: f32[8,32], index: 1, kind: input, shape index: {}]   ;;  %s242_s3 = inlined_call_operand.vmem [shape: f32[1,8,1], index: 3, kind: output, shape index: {}]   ;;  %s243_s2 = inlined_call_operand.vmem [shape: f32[8,1], index: 2, kind: input, shape index: {}]  }
   0x1   :  { %189 = vset.pattern.permute.xlu0 %v194_v0  ;;  %v102_v1 = vld [vmem:[%s240_s0] sm:$0xff]  ;;  %v195_v21 = vmov 0.0  }
   0x2   :  { %114 = vperm.xlu0 %189, %v102_v1   ;;  %v101_v2 = vld [vmem:[%s241_s1] sm:$0xff]  ;;  %v112_v5 = vand.u32 127, %v111_v4  ;;  %100 = vst.msk [vmem:[%s242_s3] sm:$0xff] %vm99_vm3, %v195_v21 }
   0x3   :  { %v122_v3 = vsel %vm118_vm0, %v101_v2, -inf  ;;  %v103_v32 = vld [vmem:[%s243_s2] sm:$0xff] }
   0x9   :  { %v160_v38 = vld [vmem:[%s242_s3] sm:$0xff] }
  0x21   :  { %123 = vmax.xlane.f32.xlu0 %v122_v3 }
  0x81   :  { %v115_v6 = vpop.permute.xlu0 %114 }
  0x82   :  { %vm116_vm1 = vcmp.eq.s32.totalorder %v112_v5, %v115_v6 }
  0x83   :  { %v117_v7 = vsel %vm116_vm1, %v101_v2, 0.0 }
  0x84   :  { %v119_v8 = vsel %vm118_vm0, %v117_v7, 0.0 }
  0x85   :  { %120 = vadd.xlane.f32.xlu1 %v119_v8 }
  0xae   :  { %v124_v9 = vpop.xlane.xlu0 %123 }
  0xaf   :  { %v125_v10 = vsub.f32 %v101_v2, %v124_v9 }
  0xb1   :  { %v126_v11 = vmul.f32 1.442695, %v125_v10 }
  0xb3   :  { %190 = vpow2.f32 %v126_v11 }
  0xbd   :  { %v191_v12 = vpop.eup %190 }
  0xbe   :  { %v128_v13 = vsel %vm118_vm0, %v191_v12, 0.0 }
  0xbf   :  { %129 = vadd.xlane.f32.xlu1 %v128_v13 }
 0x112   :  { %v121_v14 = vpop.xlane.xlu1 %120 }
 0x113   :  { %vm138_vm2 = vcmp.gt.f32.partialorder %v101_v2, %v121_v14 }
 0x114   :  { %v139_v15 = vsel %vm138_vm2, 1, %v194_v0 }
 0x115   :  { %v140_v16 = vsel %vm118_vm0, %v139_v15, 0 }
 0x116   :  { %v142_v17 = vshrl.u32 %v140_v16, 16  ;;  %v141_v19 = vand.u32 65535, %v140_v16 }
 0x118   :  { %v144_v18 = vcvt.s32.f32 %v142_v17  ;;  %v143_v20 = vcvt.s32.f32 %v141_v19 }
 0x11a   :  { %147 = vadd.xlane.f32.xlu1 %v144_v18 }
 0x11e   :  { %145 = vadd.xlane.f32.xlu1 %v143_v20 }
 0x14c   :  { %v130_v22 = vpop.xlane.xlu1 %129 }
 0x14d   :  { %192 = vlog2.f32 %v130_v22 }
 0x157   :  { %v193_v23 = vpop.eup %192 }
 0x158   :  { %v132_v25 = vmul.f32 0.6931472, %v193_v23 }
 0x15a   :  { %v133_v28 = vadd.f32 %v132_v25, %v124_v9 }
 0x15c   :  { %v134_v33 = vsub.f32 %v133_v28, %v121_v14 }
 0x15e   :  { %v136_v36 = vmul.f32 0.125, %v134_v33 }
 0x1a7   :  { %v148_v24 = vpop.xlane.xlu1 %147 }
 0x1a8   :  { %v150_v26 = vcvt.f32.s32 %v148_v24 }
 0x1aa   :  { %v151_v29 = vshll.u32 %v150_v26, 16 }
 0x1ab   :  { %v146_v27 = vpop.xlane.xlu1 %145 }
 0x1ac   :  { %v149_v30 = vcvt.f32.s32 %v146_v27 }
 0x1ae   :  { %v152_v31 = vadd.s32 %v151_v29, %v149_v30 }
 0x1b0   :  { %vm153_vm4 = vcmp.lt.s32.totalorder %v152_v31, 5 }
 0x1b1   :  { %v186_v34 = vsel %vm153_vm4, 1.0, %v195_v21 }
 0x1b2   :  { %v156_v35 = vmul.f32 %v186_v34, %v103_v32 }
 0x1b4   :  { %v158_v37 = vmul.f32 -0.0625, %v156_v35 }
 0x1b6   :  { %v159_v39 = vadd.f32 %v158_v37, %v136_v36 }
 0x1b8   :  { %v161_v40 = vadd.f32 %v160_v38, %v159_v39 }
 0x1ba   :  { %163 = vst.msk [vmem:[%s242_s3] sm:$0xff] %vm99_vm3, %v161_v40 }

</bundles_post_ra>
